<compile_context>
chip_gen: v7x
topology: tpu7x:2x2x1
jax: 0.10.0
libtpu: 0.0.40
codegen_flags: <defaults>
</compile_context>

<pallas_src>
import jax
import jax.numpy as jnp
from jax.experimental import pallas as pl
from jax.experimental.pallas import tpu as pltpu

LN_EPS = 1e-5  # matches torch.nn.LayerNorm default
_LANE = 128
_SUBLANE = 8


def _round_up(x, m):
    return ((x + m - 1) // m) * m


def task_head_kernel(x_ref, w1_ref, b1_ref, g_ref, beta_ref, w2_ref, b2_ref, o_ref):
    # Linear 1 on the MXU: feed operands in their native dtype (bf16 stays bf16
    # so v6e/v7x run at full MXU rate), accumulate in f32.
    h = jnp.dot(x_ref[...], w1_ref[...], preferred_element_type=jnp.float32)
    h = h + b1_ref[...].astype(jnp.float32)

    # LayerNorm over the feature axis, in f32 (v5e has no bf16 VPU/EUP).
    mean = jnp.mean(h, axis=-1, keepdims=True)
    centered = h - mean
    var = jnp.mean(centered * centered, axis=-1, keepdims=True)
    hn = centered * jax.lax.rsqrt(var + LN_EPS)
    hn = hn * g_ref[...].astype(jnp.float32) + beta_ref[...].astype(jnp.float32)

    # ReLU
    hn = jnp.maximum(hn, 0.0)

    # Dropout is identity in eval mode.
    # TODO(synk): training-mode dropout (pltpu.prng_random_bits mask) not implemented.

    # Linear 2 on the MXU (activations cast back to the weight dtype for bf16).
    out = jnp.dot(hn.astype(w2_ref.dtype), w2_ref[...],
                  preferred_element_type=jnp.float32)
    out = out + b2_ref[...].astype(jnp.float32)
    o_ref[...] = out.astype(o_ref.dtype)


def _choose_block_b(B, input_dim, out_pad, itemsize, vmem_budget, resident_bytes):
    """Pick the batch tile: as large as the VMEM budget allows (capped at 1024)."""
    # Per batch-row cost: double-buffered x tile + double-buffered output tile.
    per_row = 2 * input_dim * itemsize + 2 * out_pad * itemsize
    cap = (vmem_budget - resident_bytes) // max(per_row, 1)
    cap = max(_SUBLANE, min(1024, (cap // _SUBLANE) * _SUBLANE))

    b8 = _round_up(B, _SUBLANE)
    if b8 <= cap:
        block_b = b8
        # Enough rows: split into >=2 programs so v7x's two TensorCores both get
        # work (neutral on single-TC v5e/v6e).
        if b8 >= 2 * _LANE:
            block_b = _round_up(-(-b8 // 2), _SUBLANE)
        return block_b
    return cap


def base_task_head_forward(x, w1, b1, gamma, beta, w2, b2, *, block_b=None,
                           vmem_budget_bytes=32 * 1024 * 1024,
                           single_buffer_params=True):
    """Run the fused task-head MLP. x: [B, input_dim] -> [B, output_dim]."""
    B, input_dim = x.shape
    hidden_dim = w1.shape[1]
    output_dim = w2.shape[1]
    dtype = x.dtype
    itemsize = jnp.dtype(dtype).itemsize

    # Lane-dense output: pad the output feature dim to a multiple of 128 so the
    # store is a full-lane (unmasked) vst. Extra columns are exactly zero.
    out_pad = _round_up(max(output_dim, _LANE), _LANE)
    w2p = jnp.zeros((hidden_dim, out_pad), w2.dtype).at[:, :output_dim].set(w2)
    b2p = jnp.zeros((1, out_pad), b2.dtype).at[0, :output_dim].set(b2)

    # Biases / LN params as 2D (1, D) for TPU-friendly layouts.
    b1_2d = b1.reshape(1, hidden_dim)
    g_2d = gamma.reshape(1, hidden_dim)
    beta_2d = beta.reshape(1, hidden_dim)

    # Conservative resident-parameter footprint (assume double-buffered fallback).
    resident = 2 * itemsize * (w1.size + w2p.size + b1_2d.size + g_2d.size
                               + beta_2d.size + b2p.size)

    if block_b is None:
        block_b = _choose_block_b(B, input_dim, out_pad, itemsize,
                                  vmem_budget_bytes, resident)

    # Ragged batches are padded (instead of asserting) and sliced back at the end.
    B_pad = _round_up(B, block_b)
    if B_pad != B:
        x = jnp.pad(x, ((0, B_pad - B), (0, 0)))

    grid = (B_pad // block_b,)

    cost = pl.CostEstimate(
        flops=int(2 * B_pad * (input_dim * hidden_dim + hidden_dim * out_pad)
                  + 8 * B_pad * hidden_dim),
        transcendentals=int(B_pad),  # one rsqrt per row
        bytes_accessed=int(itemsize * (B_pad * input_dim + B_pad * out_pad
                                       + w1.size + w2p.size + b1_2d.size
                                       + g_2d.size + beta_2d.size + b2p.size)),
    )

    def build(single_buf):
        # Weights/biases/LN params never change across the grid -> single-buffer
        # them (saves VMEM, matters most on v7x's 64 MiB).
        pm = {"pipeline_mode": pl.Buffered(1)} if single_buf else {}
        in_specs = [
            pl.BlockSpec((block_b, input_dim), lambda i: (i, 0)),            # x tile
            pl.BlockSpec((input_dim, hidden_dim), lambda i: (0, 0), **pm),   # W1
            pl.BlockSpec((1, hidden_dim), lambda i: (0, 0), **pm),           # b1
            pl.BlockSpec((1, hidden_dim), lambda i: (0, 0), **pm),           # LN gamma
            pl.BlockSpec((1, hidden_dim), lambda i: (0, 0), **pm),           # LN beta
            pl.BlockSpec((hidden_dim, out_pad), lambda i: (0, 0), **pm),     # W2
            pl.BlockSpec((1, out_pad), lambda i: (0, 0), **pm),              # b2
        ]
        return pl.pallas_call(
            task_head_kernel,
            out_shape=jax.ShapeDtypeStruct((B_pad, out_pad), dtype),
            grid_spec=pl.GridSpec(
                grid=grid,
                in_specs=in_specs,
                out_specs=pl.BlockSpec((block_b, out_pad), lambda i: (i, 0)),
            ),
            compiler_params=pltpu.CompilerParams(
                dimension_semantics=("parallel",),
                vmem_limit_bytes=48 * 1024 * 1024,
            ),
            cost_estimate=cost,
        )

    args = (x, w1, b1_2d, g_2d, beta_2d, w2p, b2p)
    if single_buffer_params:
        try:
            out = build(True)(*args)
        except Exception:
            # Installed JAX may not support pl.Buffered(1); fall back to the
            # default double-buffered (still correct) configuration.
            out = build(False)(*args)
    else:
        out = build(False)(*args)

    return out[:B, :output_dim]


def reference_forward(x, w1, b1, gamma, beta, w2, b2):
    h = x @ w1 + b1
    mean = jnp.mean(h, axis=-1, keepdims=True)
    var = jnp.mean((h - mean) ** 2, axis=-1, keepdims=True)
    hn = (h - mean) / jnp.sqrt(var + LN_EPS) * gamma + beta
    hn = jnp.maximum(hn, 0.0)
    return hn @ w2 + b2


if __name__ == "__main__":
    # Small shapes consistent with the module:
    # input_dim=32 -> hidden_dims=[16] (input_dim // 2), output_dim=4, batch=16.
    B, input_dim, output_dim = 16, 32, 4
    hidden_dim = input_dim // 2

    key = jax.random.PRNGKey(0)
    kx, kw1, kb1, kw2, kb2, kg, kbeta, kx2 = jax.random.split(key, 8)

    x = jax.random.normal(kx, (B, input_dim), dtype=jnp.float32)

    # Deterministic synthetic parameters (PyTorch-Linear-like scale).
    w1 = jax.random.uniform(kw1, (input_dim, hidden_dim), jnp.float32,
                            -1.0 / (input_dim ** 0.5), 1.0 / (input_dim ** 0.5))
    b1 = jax.random.uniform(kb1, (hidden_dim,), jnp.float32,
                            -1.0 / (input_dim ** 0.5), 1.0 / (input_dim ** 0.5))
    gamma = 1.0 + 0.1 * jax.random.normal(kg, (hidden_dim,), jnp.float32)
    beta = 0.1 * jax.random.normal(kbeta, (hidden_dim,), jnp.float32)
    w2 = jax.random.uniform(kw2, (hidden_dim, output_dim), jnp.float32,
                            -1.0 / (hidden_dim ** 0.5), 1.0 / (hidden_dim ** 0.5))
    b2 = jax.random.uniform(kb2, (output_dim,), jnp.float32,
                            -1.0 / (hidden_dim ** 0.5), 1.0 / (hidden_dim ** 0.5))

    # --- f32, small batch (single program) ---
    out = jax.block_until_ready(base_task_head_forward(x, w1, b1, gamma, beta, w2, b2))
    ref = reference_forward(x, w1, b1, gamma, beta, w2, b2)
    assert out.shape == (B, output_dim)
    assert jnp.allclose(out, ref, atol=1e-4, rtol=1e-4), "f32 mismatch vs JAX reference"

    # --- f32, ragged larger batch (exercises padding + multi-program grid) ---
    B2 = 300
    x2 = jax.random.normal(kx2, (B2, input_dim), dtype=jnp.float32)
    out2 = jax.block_until_ready(base_task_head_forward(x2, w1, b1, gamma, beta, w2, b2))
    ref2 = reference_forward(x2, w1, b1, gamma, beta, w2, b2)
    assert out2.shape == (B2, output_dim)
    assert jnp.allclose(out2, ref2, atol=1e-4, rtol=1e-4), "ragged-batch mismatch"

    # --- bf16 path (native-dtype MXU feeding for v6e/v7x; LN stays f32) ---
    bf = jnp.bfloat16
    outb = jax.block_until_ready(base_task_head_forward(
        x.astype(bf), w1.astype(bf), b1.astype(bf), gamma.astype(bf),
        beta.astype(bf), w2.astype(bf), b2.astype(bf)))
    assert outb.shape == (B, output_dim)
    assert jnp.allclose(outb.astype(jnp.float32), ref, atol=0.2, rtol=0.2), \
        "bf16 mismatch vs f32 reference"

    print("KERNEL_OK")
</pallas_src>

<mosaic_0001>
module attributes {stable_mosaic.version = 11 : i64} {
  func.func @task_head_kernel(%arg0: i32, %arg1: memref<16x32xf32, #tpu.memory_space<vmem>>, %arg2: memref<32x16xf32, #tpu.memory_space<vmem>>, %arg3: memref<1x16xf32, #tpu.memory_space<vmem>>, %arg4: memref<1x16xf32, #tpu.memory_space<vmem>>, %arg5: memref<1x16xf32, #tpu.memory_space<vmem>>, %arg6: memref<16x128xf32, #tpu.memory_space<vmem>>, %arg7: memref<1x128xf32, #tpu.memory_space<vmem>>, %arg8: memref<16x128xf32, #tpu.memory_space<vmem>>) attributes {dimension_semantics = [#tpu.dimension_semantics<parallel>], iteration_bounds = array<i64: 1>, scalar_prefetch = 0 : i64, scratch_operands = 0 : i64, tpu.core_type = #tpu.core_type<tc>, window_params = [{transform_indices = @transform_0, window_bounds = array<i64: 16, 32>}, {pipeline_mode = #tpu.pipeline_mode<synchronous>, transform_indices = @transform_1, window_bounds = array<i64: 32, 16>}, {pipeline_mode = #tpu.pipeline_mode<synchronous>, transform_indices = @transform_2, window_bounds = array<i64: 1, 16>}, {pipeline_mode = #tpu.pipeline_mode<synchronous>, transform_indices = @transform_3, window_bounds = array<i64: 1, 16>}, {pipeline_mode = #tpu.pipeline_mode<synchronous>, transform_indices = @transform_4, window_bounds = array<i64: 1, 16>}, {pipeline_mode = #tpu.pipeline_mode<synchronous>, transform_indices = @transform_5, window_bounds = array<i64: 16, 128>}, {pipeline_mode = #tpu.pipeline_mode<synchronous>, transform_indices = @transform_6, window_bounds = array<i64: 1, 128>}, {transform_indices = @transform_7, window_bounds = array<i64: 16, 128>}]} {
    %c0 = arith.constant 0 : index
    %c0_0 = arith.constant 0 : index
    %0 = vector.load %arg1[%c0, %c0_0] : memref<16x32xf32, #tpu.memory_space<vmem>>, vector<16x32xf32>
    %c0_1 = arith.constant 0 : index
    %c0_2 = arith.constant 0 : index
    %1 = vector.load %arg2[%c0_1, %c0_2] : memref<32x16xf32, #tpu.memory_space<vmem>>, vector<32x16xf32>
    %cst = arith.constant dense<0.000000e+00> : vector<16x16xf32>
    %2 = tpu.matmul %0, %1, %cst {dimension_numbers = #tpu.dot_dimension_numbers<[1], [0], [0], [1], [0, 0, 1, 1], [], []>} : vector<16x32xf32>, vector<32x16xf32>, vector<16x16xf32> -> vector<16x16xf32>
    %c0_3 = arith.constant 0 : index
    %c0_4 = arith.constant 0 : index
    %3 = vector.load %arg3[%c0_3, %c0_4] : memref<1x16xf32, #tpu.memory_space<vmem>>, vector<1x16xf32>
    %4 = vector.broadcast %3 : vector<1x16xf32> to vector<16x16xf32>
    %5 = arith.addf %2, %4 : vector<16x16xf32>
    %cst_5 = arith.constant dense<0.000000e+00> : vector<16xf32>
    %6 = vector.multi_reduction <add>, %5, %cst_5 [1] : vector<16x16xf32> to vector<16xf32>
    %7 = vector.shape_cast %6 : vector<16xf32> to vector<16x1xf32>
    %cst_6 = arith.constant 1.600000e+01 : f32
    %8 = vector.broadcast %cst_6 : f32 to vector<16x1xf32>
    %9 = arith.divf %7, %8 : vector<16x1xf32>
    %10 = vector.broadcast %9 : vector<16x1xf32> to vector<16x16xf32>
    %11 = arith.subf %5, %10 : vector<16x16xf32>
    %12 = arith.mulf %11, %11 : vector<16x16xf32>
    %cst_7 = arith.constant dense<0.000000e+00> : vector<16xf32>
    %13 = vector.multi_reduction <add>, %12, %cst_7 [1] : vector<16x16xf32> to vector<16xf32>
    %14 = vector.shape_cast %13 : vector<16xf32> to vector<16x1xf32>
    %cst_8 = arith.constant 1.600000e+01 : f32
    %15 = vector.broadcast %cst_8 : f32 to vector<16x1xf32>
    %16 = arith.divf %14, %15 : vector<16x1xf32>
    %cst_9 = arith.constant 9.99999974E-6 : f32
    %17 = vector.broadcast %cst_9 : f32 to vector<16x1xf32>
    %18 = arith.addf %16, %17 : vector<16x1xf32>
    %19 = math.rsqrt %18 : vector<16x1xf32>
    %20 = vector.broadcast %19 : vector<16x1xf32> to vector<16x16xf32>
    %21 = arith.mulf %11, %20 : vector<16x16xf32>
    %c0_10 = arith.constant 0 : index
    %c0_11 = arith.constant 0 : index
    %22 = vector.load %arg4[%c0_10, %c0_11] : memref<1x16xf32, #tpu.memory_space<vmem>>, vector<1x16xf32>
    %23 = vector.broadcast %22 : vector<1x16xf32> to vector<16x16xf32>
    %24 = arith.mulf %21, %23 : vector<16x16xf32>
    %c0_12 = arith.constant 0 : index
    %c0_13 = arith.constant 0 : index
    %25 = vector.load %arg5[%c0_12, %c0_13] : memref<1x16xf32, #tpu.memory_space<vmem>>, vector<1x16xf32>
    %26 = vector.broadcast %25 : vector<1x16xf32> to vector<16x16xf32>
    %27 = arith.addf %24, %26 : vector<16x16xf32>
    %cst_14 = arith.constant 0.000000e+00 : f32
    %28 = vector.broadcast %cst_14 : f32 to vector<16x16xf32>
    %29 = arith.maximumf %27, %28 : vector<16x16xf32>
    %c0_15 = arith.constant 0 : index
    %c0_16 = arith.constant 0 : index
    %30 = vector.load %arg6[%c0_15, %c0_16] : memref<16x128xf32, #tpu.memory_space<vmem>>, vector<16x128xf32>
    %cst_17 = arith.constant dense<0.000000e+00> : vector<16x128xf32>
    %31 = tpu.matmul %29, %30, %cst_17 {dimension_numbers = #tpu.dot_dimension_numbers<[1], [0], [0], [1], [0, 0, 1, 1], [], []>} : vector<16x16xf32>, vector<16x128xf32>, vector<16x128xf32> -> vector<16x128xf32>
    %c0_18 = arith.constant 0 : index
    %c0_19 = arith.constant 0 : index
    %32 = vector.load %arg7[%c0_18, %c0_19] : memref<1x128xf32, #tpu.memory_space<vmem>>, vector<1x128xf32>
    %33 = vector.broadcast %32 : vector<1x128xf32> to vector<16x128xf32>
    %34 = arith.addf %31, %33 : vector<16x128xf32>
    %c0_20 = arith.constant 0 : index
    %c0_21 = arith.constant 0 : index
    %35 = vector.load %arg8[%c0_20, %c0_21] : memref<16x128xf32, #tpu.memory_space<vmem>>, vector<16x128xf32>
    tpu.vector_store %arg8[%c0_20, %c0_21], %34 {strides = array<i32>} : memref<16x128xf32, #tpu.memory_space<vmem>>, vector<16x128xf32>,
    return
  }
  func.func @transform_0(%arg0: i32) -> (i32, i32) {
    %c0_i32 = arith.constant 0 : i32
    %c0_i32_0 = arith.constant 0 : i32
    return %arg0, %c0_i32 : i32, i32
  }
  func.func @transform_1(%arg0: i32) -> (i32, i32) {
    %c0_i32 = arith.constant 0 : i32
    %c0_i32_0 = arith.constant 0 : i32
    %c0_i32_1 = arith.constant 0 : i32
    return %c0_i32, %c0_i32_0 : i32, i32
  }
  func.func @transform_2(%arg0: i32) -> (i32, i32) {
    %c0_i32 = arith.constant 0 : i32
    %c0_i32_0 = arith.constant 0 : i32
    %c0_i32_1 = arith.constant 0 : i32
    return %c0_i32, %c0_i32_0 : i32, i32
  }
  func.func @transform_3(%arg0: i32) -> (i32, i32) {
    %c0_i32 = arith.constant 0 : i32
    %c0_i32_0 = arith.constant 0 : i32
    %c0_i32_1 = arith.constant 0 : i32
    return %c0_i32, %c0_i32_0 : i32, i32
  }
  func.func @transform_4(%arg0: i32) -> (i32, i32) {
    %c0_i32 = arith.constant 0 : i32
    %c0_i32_0 = arith.constant 0 : i32
    %c0_i32_1 = arith.constant 0 : i32
    return %c0_i32, %c0_i32_0 : i32, i32
  }
  func.func @transform_5(%arg0: i32) -> (i32, i32) {
    %c0_i32 = arith.constant 0 : i32
    %c0_i32_0 = arith.constant 0 : i32
    %c0_i32_1 = arith.constant 0 : i32
    return %c0_i32, %c0_i32_0 : i32, i32
  }
  func.func @transform_6(%arg0: i32) -> (i32, i32) {
    %c0_i32 = arith.constant 0 : i32
    %c0_i32_0 = arith.constant 0 : i32
    %c0_i32_1 = arith.constant 0 : i32
    return %c0_i32, %c0_i32_0 : i32, i32
  }
  func.func @transform_7(%arg0: i32) -> (i32, i32) {
    %c0_i32 = arith.constant 0 : i32
    %c0_i32_0 = arith.constant 0 : i32
    return %arg0, %c0_i32 : i32, i32
  }
}

module attributes {stable_mosaic.version = 11 : i64} {
  func.func @task_head_kernel(%arg0: i32, %arg1: memref<16x32xf32, #tpu.memory_space<vmem>>, %arg2: memref<32x16xf32, #tpu.memory_space<vmem>>, %arg3: memref<1x16xf32, #tpu.memory_space<vmem>>, %arg4: memref<1x16xf32, #tpu.memory_space<vmem>>, %arg5: memref<1x16xf32, #tpu.memory_space<vmem>>, %arg6: memref<16x128xf32, #tpu.memory_space<vmem>>, %arg7: memref<1x128xf32, #tpu.memory_space<vmem>>, %arg8: memref<16x128xf32, #tpu.memory_space<vmem>>) attributes {dimension_semantics = [#tpu.dimension_semantics<parallel>], iteration_bounds = array<i64: 1>, scalar_prefetch = 0 : i64, scratch_operands = 0 : i64, tpu.core_type = #tpu.core_type<tc>, window_params = [{transform_indices = @transform_0, window_bounds = array<i64: 16, 32>}, {pipeline_mode = #tpu.pipeline_mode<synchronous>, transform_indices = @transform_1, window_bounds = array<i64: 32, 16>}, {pipeline_mode = #tpu.pipeline_mode<synchronous>, transform_indices = @transform_2, window_bounds = array<i64: 1, 16>}, {pipeline_mode = #tpu.pipeline_mode<synchronous>, transform_indices = @transform_3, window_bounds = array<i64: 1, 16>}, {pipeline_mode = #tpu.pipeline_mode<synchronous>, transform_indices = @transform_4, window_bounds = array<i64: 1, 16>}, {pipeline_mode = #tpu.pipeline_mode<synchronous>, transform_indices = @transform_5, window_bounds = array<i64: 16, 128>}, {pipeline_mode = #tpu.pipeline_mode<synchronous>, transform_indices = @transform_6, window_bounds = array<i64: 1, 128>}, {transform_indices = @transform_7, window_bounds = array<i64: 16, 128>}]} {
    %c0 = arith.constant 0 : index
    %c0_0 = arith.constant 0 : index
    %0 = vector.load %arg1[%c0, %c0_0] : memref<16x32xf32, #tpu.memory_space<vmem>>, vector<16x32xf32>
    %c0_1 = arith.constant 0 : index
    %c0_2 = arith.constant 0 : index
    %1 = vector.load %arg2[%c0_1, %c0_2] : memref<32x16xf32, #tpu.memory_space<vmem>>, vector<32x16xf32>
    %cst = arith.constant dense<0.000000e+00> : vector<16x16xf32>
    %2 = tpu.matmul %0, %1, %cst {dimension_numbers = #tpu.dot_dimension_numbers<[1], [0], [0], [1], [0, 0, 1, 1], [], []>} : vector<16x32xf32>, vector<32x16xf32>, vector<16x16xf32> -> vector<16x16xf32>
    %c0_3 = arith.constant 0 : index
    %c0_4 = arith.constant 0 : index
    %3 = vector.load %arg3[%c0_3, %c0_4] : memref<1x16xf32, #tpu.memory_space<vmem>>, vector<1x16xf32>
    %4 = vector.broadcast %3 : vector<1x16xf32> to vector<16x16xf32>
    %5 = arith.addf %2, %4 : vector<16x16xf32>
    %cst_5 = arith.constant dense<0.000000e+00> : vector<16xf32>
    %6 = vector.multi_reduction <add>, %5, %cst_5 [1] : vector<16x16xf32> to vector<16xf32>
    %7 = vector.shape_cast %6 : vector<16xf32> to vector<16x1xf32>
    %cst_6 = arith.constant 1.600000e+01 : f32
    %8 = vector.broadcast %cst_6 : f32 to vector<16x1xf32>
    %9 = arith.divf %7, %8 : vector<16x1xf32>
    %10 = vector.broadcast %9 : vector<16x1xf32> to vector<16x16xf32>
    %11 = arith.subf %5, %10 : vector<16x16xf32>
    %12 = arith.mulf %11, %11 : vector<16x16xf32>
    %cst_7 = arith.constant dense<0.000000e+00> : vector<16xf32>
    %13 = vector.multi_reduction <add>, %12, %cst_7 [1] : vector<16x16xf32> to vector<16xf32>
    %14 = vector.shape_cast %13 : vector<16xf32> to vector<16x1xf32>
    %cst_8 = arith.constant 1.600000e+01 : f32
    %15 = vector.broadcast %cst_8 : f32 to vector<16x1xf32>
    %16 = arith.divf %14, %15 : vector<16x1xf32>
    %cst_9 = arith.constant 9.99999974E-6 : f32
    %17 = vector.broadcast %cst_9 : f32 to vector<16x1xf32>
    %18 = arith.addf %16, %17 : vector<16x1xf32>
    %19 = math.rsqrt %18 : vector<16x1xf32>
    %20 = vector.broadcast %19 : vector<16x1xf32> to vector<16x16xf32>
    %21 = arith.mulf %11, %20 : vector<16x16xf32>
    %c0_10 = arith.constant 0 : index
    %c0_11 = arith.constant 0 : index
    %22 = vector.load %arg4[%c0_10, %c0_11] : memref<1x16xf32, #tpu.memory_space<vmem>>, vector<1x16xf32>
    %23 = vector.broadcast %22 : vector<1x16xf32> to vector<16x16xf32>
    %24 = arith.mulf %21, %23 : vector<16x16xf32>
    %c0_12 = arith.constant 0 : index
    %c0_13 = arith.constant 0 : index
    %25 = vector.load %arg5[%c0_12, %c0_13] : memref<1x16xf32, #tpu.memory_space<vmem>>, vector<1x16xf32>
    %26 = vector.broadcast %25 : vector<1x16xf32> to vector<16x16xf32>
    %27 = arith.addf %24, %26 : vector<16x16xf32>
    %cst_14 = arith.constant 0.000000e+00 : f32
    %28 = vector.broadcast %cst_14 : f32 to vector<16x16xf32>
    %29 = arith.maximumf %27, %28 : vector<16x16xf32>
    %c0_15 = arith.constant 0 : index
    %c0_16 = arith.constant 0 : index
    %30 = vector.load %arg6[%c0_15, %c0_16] : memref<16x128xf32, #tpu.memory_space<vmem>>, vector<16x128xf32>
    %cst_17 = arith.constant dense<0.000000e+00> : vector<16x128xf32>
    %31 = tpu.matmul %29, %30, %cst_17 {dimension_numbers = #tpu.dot_dimension_numbers<[1], [0], [0], [1], [0, 0, 1, 1], [], []>} : vector<16x16xf32>, vector<16x128xf32>, vector<16x128xf32> -> vector<16x128xf32>
    %c0_18 = arith.constant 0 : index
    %c0_19 = arith.constant 0 : index
    %32 = vector.load %arg7[%c0_18, %c0_19] : memref<1x128xf32, #tpu.memory_space<vmem>>, vector<1x128xf32>
    %33 = vector.broadcast %32 : vector<1x128xf32> to vector<16x128xf32>
    %34 = arith.addf %31, %33 : vector<16x128xf32>
    %c0_20 = arith.constant 0 : index
    %c0_21 = arith.constant 0 : index
    %35 = vector.load %arg8[%c0_20, %c0_21] : memref<16x128xf32, #tpu.memory_space<vmem>>, vector<16x128xf32>
    tpu.vector_store %arg8[%c0_20, %c0_21], %34 {strides = array<i32>} : memref<16x128xf32, #tpu.memory_space<vmem>>, vector<16x128xf32>,
    return
  }
  func.func @transform_0(%arg0: i32) -> (i32, i32) {
    %c0_i32 = arith.constant 0 : i32
    %c0_i32_0 = arith.constant 0 : i32
    return %arg0, %c0_i32 : i32, i32
  }
  func.func @transform_1(%arg0: i32) -> (i32, i32) {
    %c0_i32 = arith.constant 0 : i32
    %c0_i32_0 = arith.constant 0 : i32
    %c0_i32_1 = arith.constant 0 : i32
    return %c0_i32, %c0_i32_0 : i32, i32
  }
  func.func @transform_2(%arg0: i32) -> (i32, i32) {
    %c0_i32 = arith.constant 0 : i32
    %c0_i32_0 = arith.constant 0 : i32
    %c0_i32_1 = arith.constant 0 : i32
    return %c0_i32, %c0_i32_0 : i32, i32
  }
  func.func @transform_3(%arg0: i32) -> (i32, i32) {
    %c0_i32 = arith.constant 0 : i32
    %c0_i32_0 = arith.constant 0 : i32
    %c0_i32_1 = arith.constant 0 : i32
    return %c0_i32, %c0_i32_0 : i32, i32
  }
  func.func @transform_4(%arg0: i32) -> (i32, i32) {
    %c0_i32 = arith.constant 0 : i32
    %c0_i32_0 = arith.constant 0 : i32
    %c0_i32_1 = arith.constant 0 : i32
    return %c0_i32, %c0_i32_0 : i32, i32
  }
  func.func @transform_5(%arg0: i32) -> (i32, i32) {
    %c0_i32 = arith.constant 0 : i32
    %c0_i32_0 = arith.constant 0 : i32
    %c0_i32_1 = arith.constant 0 : i32
    return %c0_i32, %c0_i32_0 : i32, i32
  }
  func.func @transform_6(%arg0: i32) -> (i32, i32) {
    %c0_i32 = arith.constant 0 : i32
    %c0_i32_0 = arith.constant 0 : i32
    %c0_i32_1 = arith.constant 0 : i32
    return %c0_i32, %c0_i32_0 : i32, i32
  }
  func.func @transform_7(%arg0: i32) -> (i32, i32) {
    %c0_i32 = arith.constant 0 : i32
    %c0_i32_0 = arith.constant 0 : i32
    return %arg0, %c0_i32 : i32, i32
  }
}

</mosaic_0001>

<bundles_post_ra>
// kernel: tpu_custom_call.1
= control target key start
LH: loop header
LB: loop body
LE: loop exit
PB: predicated region body
PF: predicated region fallthrough
CT: control target
= control target key end

     0   :  { %vm40_vm0 = vcmask 261120   ;;  %s454_s0 = inlined_call_operand.vmem [shape: f32[16,32], index: 0, kind: input, shape index: {}]   ;;  %s455_s1 = inlined_call_operand.vmem [shape: f32[32,16], index: 1, kind: input, shape index: {}]   ;;  %s456_s2 = inlined_call_operand.vmem [shape: f32[1,16], index: 2, kind: input, shape index: {}]   ;;  %s457_s3 = inlined_call_operand.vmem [shape: f32[1,16], index: 3, kind: input, shape index: {}]   ;;  %s458_s4 = inlined_call_operand.vmem [shape: f32[1,16], index: 4, kind: input, shape index: {}]   ;;  %s459_s5 = inlined_call_operand.vmem [shape: f32[16,128], index: 5, kind: input, shape index: {}]   ;;  %s460_s6 = inlined_call_operand.vmem [shape: f32[1,128], index: 6, kind: input, shape index: {}]   ;;  %s461_s7 = inlined_call_operand.hbm [shape: f32[16,128], index: 7, kind: output, shape index: {}]  }
   0x1   :  { %v29_v0 = vld [vmem:[%s455_s1] sm:$0xff]  ;;  %v30_v1 = vld [vmem:[%s455_s1 + $0x8] sm:$0xff]  ;;  %v31_v2 = vld [vmem:[%s455_s1 + $0x10] sm:$0xff] }
   0x2   :  { %v314_v3 = vpack.c.bf16 %v30_v1, %v29_v0  ;;  %v32_v4 = vld [vmem:[%s455_s1 + $0x18] sm:$0xff]  ;;  %v27_v5 = vld [vmem:[%s454_s0] sm:$0xff] }
   0x3   :  { %v318_v6 = vpack.c.bf16 %v32_v4, %v31_v2  ;;  %304 = vmatprep.mubr.msk.f32.mxu0 %vm40_vm0, %v27_v5 }
   0x4   :  { %12 = vsyncpa [#allocation3], 0  ;;  %315 = vmatprep.subr.bf16.mxu0 %v314_v3  ;;  %v28_v7 = vld [vmem:[%s454_s0 + $0x8] sm:$0xff]  ;;  %v278_v8 = vld [vmem:[%s456_s2] ss:$0 sm:$0xff]  ;;  %vm122_vm1 = vcmask 130048  }
   0x5   :  { %317 = vmatpush3.bf16.msra.mxu0 %v314_v3  ;;  %v170_v25 = vld [vmem:[%s459_s5] sm:$0xff]  ;;  %v171_v26 = vld [vmem:[%s459_s5 + $0x8] sm:$0xff] }
   0x6   :  { %319 = vmatprep.subr.bf16.mxu0 %v318_v6  ;;  %v322_v27 = vpack.c.bf16 %v171_v26, %v170_v25  ;;  %v281_v35 = vld [vmem:[%s457_s3] ss:$0 sm:$0xff]  ;;  %s357_s3 = smov [#allocation2]  }
   0x7   :  { %v282_v37 = vld [vmem:[%s458_s4] ss:$0 sm:$0xff]  ;;  %s267_s21 = sshll.u32 %s357_s3, 4  ;;  %s268_s21 = int_to_ptr.vmem [resolvable:$true] %s267_s21 }
   0x8   :  { %323 = vmatprep.subr.bf16.mxu1 %v322_v27  ;;  %v283_v46 = vld [vmem:[%s460_s6] ss:$0 sm:$0xff]  ;;  %s333_s4 = scalar_lea.vmem %s268_s21, 256  ;;  %p338_p1 = scmp.lt.s32.totalorder %s268_s21, %s268_s21 }
   0x9   :  { %321 = vmatpush3.bf16.msra.mxu0 %v318_v6  ;;  %325 = vmatpush3.bf16.msra.mxu1 %v322_v27  ;;  %p334_p0 = scmp.ne.s32.totalorder %s268_s21, %s333_s4  ;;  %p339_p2 = scmp.lt.s32.totalorder %s333_s4, %s333_s4 }
   0xb   :  { %p340_p3 = por %p339_p2, %p338_p1 }
   0xc   :  { %305 = vmatmul.mubr.msk.f32.vlgmr.msra.gmra.mrb[0].mxu0 %vm40_vm0, %v28_v7 }
   0xd   :  { %p341_p4 = pnand %p340_p3, %p334_p0 }
  0xdf   :  { %v306_v9 = vpop.f32.mrb[0].mxu0 }
  0xe0   :  { %v113_v10 = vpop.f32.mrb[1].mxu0  ;;  %v119_v12 = vadd.f32 %v306_v9, %v278_v8 }
  0xe1   :  { %v114_v11 = vadd.f32 %v278_v8, %v113_v10 }
  0xe2   :  { %v126_v14 = vsel %vm122_vm1, %v119_v12, 0.0 }
  0xe3   :  { %v123_v13 = vsel %vm122_vm1, %v114_v11, 0.0 }
  0xe4   :  { %124 = vadd.xlane.f32.xlu0 %v123_v13 }
  0xe8   :  { %127 = vadd.xlane.f32.xlu0 %v126_v14 }
 0x171   :  { %v125_v15 = vpop.xlane.xlu0 %124 }
 0x172   :  { %v130_v16 = vmul.f32 0.0625, %v125_v15 }
 0x174   :  { %v132_v17 = vsub.f32 %v114_v11, %v130_v16 }
 0x175   :  { %v128_v18 = vpop.xlane.xlu0 %127 }
 0x176   :  { %v131_v19 = vmul.f32 0.0625, %v128_v18  ;;  %v134_v20 = vmul.f32 %v132_v17, %v132_v17 }
 0x178   :  { %v133_v21 = vsub.f32 %v119_v12, %v131_v19  ;;  %v136_v22 = vsel %vm122_vm1, %v134_v20, 0.0 }
 0x179   :  { %137 = vadd.xlane.f32.xlu1 %v136_v22 }
 0x17a   :  { %v135_v23 = vmul.f32 %v133_v21, %v133_v21 }
 0x17c   :  { %v139_v24 = vsel %vm122_vm1, %v135_v23, 0.0 }
 0x17d   :  { %140 = vadd.xlane.f32.xlu1 %v139_v24 }
 0x206   :  { %v138_v28 = vpop.xlane.xlu1 %137 }
 0x207   :  { %v142_v29 = vmul.f32 0.0625, %v138_v28 }
 0x209   :  { %v144_v30 = vadd.f32 1e-05, %v142_v29 }
 0x20a   :  { %v141_v31 = vpop.xlane.xlu1 %140 }
 0x20b   :  { %329 = vrsqrt.f32 %v144_v30  ;;  %v143_v32 = vmul.f32 0.0625, %v141_v31 }
 0x20d   :  { %v145_v33 = vadd.f32 1e-05, %v143_v32 }
 0x20f   :  { %331 = vrsqrt.f32 %v145_v33 }
 0x215   :  { %v330_v34 = vpop.eup %329 }
 0x216   :  { %v148_v36 = vmul.f32 %v330_v34, %v132_v17 }
 0x218   :  { %v157_v38 = vmul.f32 %v281_v35, %v148_v36 }
 0x219   :  { %v332_v39 = vpop.eup %331 }
 0x21a   :  { %v149_v40 = vmul.f32 %v332_v39, %v133_v21  ;;  %v166_v41 = vadd.f32 %v282_v37, %v157_v38 }
 0x21c   :  { %v158_v42 = vmul.f32 %v281_v35, %v149_v40  ;;  %v168_v43 = vmax.f32 %v166_v41, 0.0 }
 0x21e   :  { %v167_v44 = vadd.f32 %v282_v37, %v158_v42  ;;  %311 = vmatprep.mubr.msk.f32.mxu1 %vm122_vm1, %v168_v43 }
 0x220   :  { %v169_v45 = vmax.f32 %v167_v44, 0.0 }
 0x222   :  { %312 = vmatmul.mubr.msk.f32.vlgmr.msra.gmra.mrb[0].mxu1 %vm122_vm1, %v169_v45 }
 0x2f5   :  { %v313_v47 = vpop.f32.mrb[0].mxu1 }
 0x2f6   :  { %v257_v48 = vadd.f32 %v313_v47, %v283_v46  ;;  %v251_v49 = vpop.f32.mrb[1].mxu1 }
 0x2f7   :  { %v252_v50 = vadd.f32 %v283_v46, %v251_v49 }
 0x2f8   :  { %261 = vst [vmem:[#allocation2 + $0x8] sm:$0xff] %v257_v48 }
 0x2f9   :  { %260 = vst [vmem:[#allocation2] sm:$0xff] %v252_v50 }
 0x2fa   :  { %344 = shalt.err (!%p341_p4)
}
 0x2fb   :  { %s345_s6 = scalar_lea.hbm %s461_s7, 256 }
 0x2fc   :  { %p346_p5 = scmp.ne.s32.totalorder %s461_s7, %s345_s6  ;;  %p349_p6 = scmp.lt.u32.totalorder %s345_s6, %s461_s7 }
 0x2fe   :  { %p351_p7 = pnand %p349_p6, %p346_p5 }
 0x300   :  { %354 = shalt.err (!%p351_p7)
}
 0x301   :  { %s358_s28 = smov 128   ;;  %s359_s29 = smov 8  }
 0x302   :  { %273 = dma.vmem_to_hbm [thread:$0]  %s268_s21, 256, %s461_s7, [#allocation3], %s358_s28, %s358_s28, %s359_s29  }
 0x303   :  { %355 = dma.done.wait [#allocation3], 256  }
 0x304   :  { %356 = vsyncadd [#allocation3], 4294967040 }
 0x305   :  { %277 = vsyncpa [#allocation3], 1 }

// kernel: tpu_custom_call.1
= control target key start
LH: loop header
LB: loop body
LE: loop exit
PB: predicated region body
PF: predicated region fallthrough
CT: control target
= control target key end

     0   :  { %vm40_vm0 = vcmask 261120   ;;  %s454_s0 = inlined_call_operand.vmem [shape: f32[16,32], index: 0, kind: input, shape index: {}]   ;;  %s455_s1 = inlined_call_operand.vmem [shape: f32[32,16], index: 1, kind: input, shape index: {}]   ;;  %s456_s2 = inlined_call_operand.vmem [shape: f32[1,16], index: 2, kind: input, shape index: {}]   ;;  %s457_s3 = inlined_call_operand.vmem [shape: f32[1,16], index: 3, kind: input, shape index: {}]   ;;  %s458_s4 = inlined_call_operand.vmem [shape: f32[1,16], index: 4, kind: input, shape index: {}]   ;;  %s459_s5 = inlined_call_operand.vmem [shape: f32[16,128], index: 5, kind: input, shape index: {}]   ;;  %s460_s6 = inlined_call_operand.vmem [shape: f32[1,128], index: 6, kind: input, shape index: {}]   ;;  %s461_s7 = inlined_call_operand.hbm [shape: f32[16,128], index: 7, kind: output, shape index: {}]  }
   0x1   :  { %v29_v0 = vld [vmem:[%s455_s1] sm:$0xff]  ;;  %v30_v1 = vld [vmem:[%s455_s1 + $0x8] sm:$0xff]  ;;  %v31_v2 = vld [vmem:[%s455_s1 + $0x10] sm:$0xff] }
   0x2   :  { %v314_v3 = vpack.c.bf16 %v30_v1, %v29_v0  ;;  %v32_v4 = vld [vmem:[%s455_s1 + $0x18] sm:$0xff]  ;;  %v27_v5 = vld [vmem:[%s454_s0] sm:$0xff] }
   0x3   :  { %v318_v6 = vpack.c.bf16 %v32_v4, %v31_v2  ;;  %304 = vmatprep.mubr.msk.f32.mxu0 %vm40_vm0, %v27_v5 }
   0x4   :  { %12 = vsyncpa [#allocation3], 0  ;;  %315 = vmatprep.subr.bf16.mxu0 %v314_v3  ;;  %v28_v7 = vld [vmem:[%s454_s0 + $0x8] sm:$0xff]  ;;  %v278_v8 = vld [vmem:[%s456_s2] ss:$0 sm:$0xff]  ;;  %vm122_vm1 = vcmask 130048  }
   0x5   :  { %317 = vmatpush3.bf16.msra.mxu0 %v314_v3  ;;  %v170_v25 = vld [vmem:[%s459_s5] sm:$0xff]  ;;  %v171_v26 = vld [vmem:[%s459_s5 + $0x8] sm:$0xff] }
   0x6   :  { %319 = vmatprep.subr.bf16.mxu0 %v318_v6  ;;  %v322_v27 = vpack.c.bf16 %v171_v26, %v170_v25  ;;  %v281_v35 = vld [vmem:[%s457_s3] ss:$0 sm:$0xff]  ;;  %s357_s3 = smov [#allocation2]  }
   0x7   :  { %v282_v37 = vld [vmem:[%s458_s4] ss:$0 sm:$0xff]  ;;  %s267_s21 = sshll.u32 %s357_s3, 4  ;;  %s268_s21 = int_to_ptr.vmem [resolvable:$true] %s267_s21 }
   0x8   :  { %323 = vmatprep.subr.bf16.mxu1 %v322_v27  ;;  %v283_v46 = vld [vmem:[%s460_s6] ss:$0 sm:$0xff]  ;;  %s333_s4 = scalar_lea.vmem %s268_s21, 256  ;;  %p338_p1 = scmp.lt.s32.totalorder %s268_s21, %s268_s21 }
   0x9   :  { %321 = vmatpush3.bf16.msra.mxu0 %v318_v6  ;;  %325 = vmatpush3.bf16.msra.mxu1 %v322_v27  ;;  %p334_p0 = scmp.ne.s32.totalorder %s268_s21, %s333_s4  ;;  %p339_p2 = scmp.lt.s32.totalorder %s333_s4, %s333_s4 }
   0xb   :  { %p340_p3 = por %p339_p2, %p338_p1 }
   0xc   :  { %305 = vmatmul.mubr.msk.f32.vlgmr.msra.gmra.mrb[0].mxu0 %vm40_vm0, %v28_v7 }
   0xd   :  { %p341_p4 = pnand %p340_p3, %p334_p0 }
  0xdf   :  { %v306_v9 = vpop.f32.mrb[0].mxu0 }
  0xe0   :  { %v113_v10 = vpop.f32.mrb[1].mxu0  ;;  %v119_v12 = vadd.f32 %v306_v9, %v278_v8 }
  0xe1   :  { %v114_v11 = vadd.f32 %v278_v8, %v113_v10 }
  0xe2   :  { %v126_v14 = vsel %vm122_vm1, %v119_v12, 0.0 }
  0xe3   :  { %v123_v13 = vsel %vm122_vm1, %v114_v11, 0.0 }
  0xe4   :  { %124 = vadd.xlane.f32.xlu0 %v123_v13 }
  0xe8   :  { %127 = vadd.xlane.f32.xlu0 %v126_v14 }
 0x171   :  { %v125_v15 = vpop.xlane.xlu0 %124 }
 0x172   :  { %v130_v16 = vmul.f32 0.0625, %v125_v15 }
 0x174   :  { %v132_v17 = vsub.f32 %v114_v11, %v130_v16 }
 0x175   :  { %v128_v18 = vpop.xlane.xlu0 %127 }
 0x176   :  { %v131_v19 = vmul.f32 0.0625, %v128_v18  ;;  %v134_v20 = vmul.f32 %v132_v17, %v132_v17 }
 0x178   :  { %v133_v21 = vsub.f32 %v119_v12, %v131_v19  ;;  %v136_v22 = vsel %vm122_vm1, %v134_v20, 0.0 }
 0x179   :  { %137 = vadd.xlane.f32.xlu1 %v136_v22 }
 0x17a   :  { %v135_v23 = vmul.f32 %v133_v21, %v133_v21 }
 0x17c   :  { %v139_v24 = vsel %vm122_vm1, %v135_v23, 0.0 }
 0x17d   :  { %140 = vadd.xlane.f32.xlu1 %v139_v24 }
 0x206   :  { %v138_v28 = vpop.xlane.xlu1 %137 }
 0x207   :  { %v142_v29 = vmul.f32 0.0625, %v138_v28 }
 0x209   :  { %v144_v30 = vadd.f32 1e-05, %v142_v29 }
 0x20a   :  { %v141_v31 = vpop.xlane.xlu1 %140 }
 0x20b   :  { %329 = vrsqrt.f32 %v144_v30  ;;  %v143_v32 = vmul.f32 0.0625, %v141_v31 }
 0x20d   :  { %v145_v33 = vadd.f32 1e-05, %v143_v32 }
 0x20f   :  { %331 = vrsqrt.f32 %v145_v33 }
 0x215   :  { %v330_v34 = vpop.eup %329 }
 0x216   :  { %v148_v36 = vmul.f32 %v330_v34, %v132_v17 }
 0x218   :  { %v157_v38 = vmul.f32 %v281_v35, %v148_v36 }
 0x219   :  { %v332_v39 = vpop.eup %331 }
 0x21a   :  { %v149_v40 = vmul.f32 %v332_v39, %v133_v21  ;;  %v166_v41 = vadd.f32 %v282_v37, %v157_v38 }
 0x21c   :  { %v158_v42 = vmul.f32 %v281_v35, %v149_v40  ;;  %v168_v43 = vmax.f32 %v166_v41, 0.0 }
 0x21e   :  { %v167_v44 = vadd.f32 %v282_v37, %v158_v42  ;;  %311 = vmatprep.mubr.msk.f32.mxu1 %vm122_vm1, %v168_v43 }
 0x220   :  { %v169_v45 = vmax.f32 %v167_v44, 0.0 }
 0x222   :  { %312 = vmatmul.mubr.msk.f32.vlgmr.msra.gmra.mrb[0].mxu1 %vm122_vm1, %v169_v45 }
 0x2f5   :  { %v313_v47 = vpop.f32.mrb[0].mxu1 }
 0x2f6   :  { %v257_v48 = vadd.f32 %v313_v47, %v283_v46  ;;  %v251_v49 = vpop.f32.mrb[1].mxu1 }
 0x2f7   :  { %v252_v50 = vadd.f32 %v283_v46, %v251_v49 }
 0x2f8   :  { %261 = vst [vmem:[#allocation2 + $0x8] sm:$0xff] %v257_v48 }
 0x2f9   :  { %260 = vst [vmem:[#allocation2] sm:$0xff] %v252_v50 }
 0x2fa   :  { %344 = shalt.err (!%p341_p4)
}
 0x2fb   :  { %s345_s6 = scalar_lea.hbm %s461_s7, 256 }
 0x2fc   :  { %p346_p5 = scmp.ne.s32.totalorder %s461_s7, %s345_s6  ;;  %p349_p6 = scmp.lt.u32.totalorder %s345_s6, %s461_s7 }
 0x2fe   :  { %p351_p7 = pnand %p349_p6, %p346_p5 }
 0x300   :  { %354 = shalt.err (!%p351_p7)
}
 0x301   :  { %s358_s28 = smov 128   ;;  %s359_s29 = smov 8  }
 0x302   :  { %273 = dma.vmem_to_hbm [thread:$0]  %s268_s21, 256, %s461_s7, [#allocation3], %s358_s28, %s358_s28, %s359_s29  }
 0x303   :  { %355 = dma.done.wait [#allocation3], 256  }
 0x304   :  { %356 = vsyncadd [#allocation3], 4294967040 }
 0x305   :  { %277 = vsyncpa [#allocation3], 1 }

</bundles_post_ra>
